<compile_context>
chip_gen: v7x
topology: tpu7x:2x2x1
jax: 0.10.0
libtpu: 0.0.40
codegen_flags: <defaults>
</compile_context>

<pallas_src>
import jax
import jax.numpy as jnp
from jax.experimental import pallas as pl
from jax.experimental.pallas import tpu as pltpu


def _round_up(x, m):
    return (x + m - 1) // m * m


def ffnet_kernel(x_ref, w1_ref, b1_ref, w2_ref, b2_ref, out_ref, h_acc):
    """Grid = (batch_tiles, k_tiles).  K (reduction over D_in) is the last axis."""
    k = pl.program_id(1)

    @pl.when(k == 0)
    def _():
        h_acc[...] = jnp.zeros_like(h_acc)

    # Layer 1 partial product: bf16 MXU matmul, f32 accumulation.
    h_acc[...] += jnp.dot(
        x_ref[...], w1_ref[...], preferred_element_type=jnp.float32
    )

    @pl.when(k == pl.num_programs(1) - 1)
    def _():
        # Epilogue (bias + ReLU) applied exactly once, in f32 on the VPU.
        h = jnp.maximum(h_acc[...] + b1_ref[...], 0.0)
        # Layer 2: bf16 MXU matmul with f32 accumulation, bias in f32.
        o = jnp.dot(
            h.astype(jnp.bfloat16), w2_ref[...], preferred_element_type=jnp.float32
        )
        out_ref[...] = (o + b2_ref[...]).astype(out_ref.dtype)


def ffnet_forward(x_nchw, w1, b1, w2, b2, *, tb=None, tk=512):
    """x_nchw: [B, C, H, W] f32.  w1: [D_in, H], b1: [1, H], w2: [H, D_out], b2: [1, D_out].

    Returns logits [B, D_out] f32.
    """
    B = x_nchw.shape[0]
    d_in, d_hidden = w1.shape
    d_out = w2.shape[1]

    # Glue: flatten NCHW -> [B, D_in] (matches torch nn.Flatten), cast to bf16
    # for the MXU (accumulation stays f32 inside the kernel).
    x = x_nchw.reshape(B, d_in)

    # Lane-dense padding: hidden and output widths up to multiples of 128,
    # D_in up to a multiple of the K tile, batch up to a multiple of the
    # batch tile (min 8 sublanes).
    Hp = _round_up(d_hidden, 128)
    Dp = _round_up(d_out, 128)
    tk = min(tk, _round_up(d_in, 128))
    Kp = _round_up(d_in, tk)
    if tb is None:
        # 256 matches v6e/v7x 2x256 MXU; small batches just round up to 8 sublanes.
        tb = min(256, _round_up(B, 8))
    Bp = _round_up(B, tb)

    x_p = jnp.zeros((Bp, Kp), jnp.bfloat16).at[:B, :d_in].set(x.astype(jnp.bfloat16))
    w1_p = jnp.zeros((Kp, Hp), jnp.bfloat16).at[:d_in, :d_hidden].set(
        w1.astype(jnp.bfloat16))
    b1_p = jnp.zeros((1, Hp), jnp.float32).at[:, :d_hidden].set(
        b1.reshape(1, d_hidden).astype(jnp.float32))
    w2_p = jnp.zeros((Hp, Dp), jnp.bfloat16).at[:d_hidden, :d_out].set(
        w2.astype(jnp.bfloat16))
    b2_p = jnp.zeros((1, Dp), jnp.float32).at[:, :d_out].set(
        b2.reshape(1, d_out).astype(jnp.float32))

    grid = (Bp // tb, Kp // tk)

    out_padded = pl.pallas_call(
        ffnet_kernel,
        out_shape=jax.ShapeDtypeStruct((Bp, Dp), jnp.float32),
        grid_spec=pltpu.PrefetchScalarGridSpec(
            num_scalar_prefetch=0,
            grid=grid,
            in_specs=[
                pl.BlockSpec((tb, tk), lambda i, k: (i, k)),   # x tile
                pl.BlockSpec((tk, Hp), lambda i, k: (k, 0)),   # w1 K-tile
                pl.BlockSpec((1, Hp), lambda i, k: (0, 0)),    # b1 (resident)
                pl.BlockSpec((Hp, Dp), lambda i, k: (0, 0)),   # w2 (resident)
                pl.BlockSpec((1, Dp), lambda i, k: (0, 0)),    # b2 (resident)
            ],
            # Output block fixed across K -> accumulator-resident pattern.
            out_specs=pl.BlockSpec((tb, Dp), lambda i, k: (i, 0)),
            scratch_shapes=[pltpu.VMEM((tb, Hp), jnp.float32)],
        ),
        compiler_params=pltpu.CompilerParams(
            dimension_semantics=("parallel", "arbitrary"),
            # Safe on all generations (v7x physical VMEM is 64 MiB); raise on
            # v5e/v6e if weights grow and should stay fully resident.
            vmem_limit_bytes=32 * 1024 * 1024,
        ),
    )(x_p, w1_p, b1_p, w2_p, b2_p)

    # Slice padded logits back to the real problem size (outside the kernel).
    return out_padded[:B, :d_out]


def init_params(key, d_in, d_hidden, d_out):
    """Deterministic init mimicking torch.nn.Linear (uniform +/- 1/sqrt(fan_in))."""
    k1, k2, k3, k4 = jax.random.split(key, 4)
    lim1 = 1.0 / jnp.sqrt(d_in)
    lim2 = 1.0 / jnp.sqrt(d_hidden)
    w1 = jax.random.uniform(k1, (d_in, d_hidden), jnp.float32, -lim1, lim1)
    b1 = jax.random.uniform(k2, (1, d_hidden), jnp.float32, -lim1, lim1)
    w2 = jax.random.uniform(k3, (d_hidden, d_out), jnp.float32, -lim2, lim2)
    b2 = jax.random.uniform(k4, (1, d_out), jnp.float32, -lim2, lim2)
    return w1, b1, w2, b2


if __name__ == "__main__":
    key = jax.random.PRNGKey(0)
    kx, kp = jax.random.split(key)

    # Small shapes: batch=2, channels=4, spatial=16x16 -> D_in = 1024
    B, C, H, W = 2, 4, 16, 16
    d_in = C * H * W
    d_hidden = 32
    d_out = 10

    x = jax.random.normal(kx, (B, C, H, W), jnp.float32)
    w1, b1, w2, b2 = init_params(kp, d_in, d_hidden, d_out)

    out = ffnet_forward(x, w1, b1, w2, b2)
    out = jax.block_until_ready(out)

    # Reference check in plain JAX (f32 math; kernel uses bf16 MXU inputs with
    # f32 accumulation, so tolerance is loosened accordingly).
    ref = jnp.maximum(x.reshape(B, d_in) @ w1 + b1, 0.0) @ w2 + b2
    assert out.shape == (B, d_out)
    assert jnp.allclose(out, ref, atol=3e-2, rtol=3e-2), (
        f"max abs err = {jnp.max(jnp.abs(out - ref))}")

    print("KERNEL_OK")
</pallas_src>

<mosaic_0001>
module attributes {stable_mosaic.version = 11 : i64} {
  func.func @ffnet_kernel(%arg0: i32, %arg1: i32, %arg2: memref<8x512xbf16, #tpu.memory_space<vmem>>, %arg3: memref<512x128xbf16, #tpu.memory_space<vmem>>, %arg4: memref<1x128xf32, #tpu.memory_space<vmem>>, %arg5: memref<128x128xbf16, #tpu.memory_space<vmem>>, %arg6: memref<1x128xf32, #tpu.memory_space<vmem>>, %arg7: memref<8x128xf32, #tpu.memory_space<vmem>>, %arg8: memref<8x128xf32, #tpu.memory_space<vmem>>) attributes {dimension_semantics = [#tpu.dimension_semantics<parallel>, #tpu.dimension_semantics<arbitrary>], iteration_bounds = array<i64: 1, 2>, scalar_prefetch = 0 : i64, scratch_operands = 1 : i64, tpu.core_type = #tpu.core_type<tc>, window_params = [{transform_indices = @transform_0, window_bounds = array<i64: 8, 512>}, {transform_indices = @transform_1, window_bounds = array<i64: 512, 128>}, {pipeline_mode = #tpu.pipeline_mode<synchronous>, transform_indices = @transform_2, window_bounds = array<i64: 1, 128>}, {pipeline_mode = #tpu.pipeline_mode<synchronous>, transform_indices = @transform_3, window_bounds = array<i64: 128, 128>}, {pipeline_mode = #tpu.pipeline_mode<synchronous>, transform_indices = @transform_4, window_bounds = array<i64: 1, 128>}, {transform_indices = @transform_5, window_bounds = array<i64: 8, 128>}]} {
    %c0_i32 = arith.constant 0 : i32
    %0 = arith.cmpi eq, %arg1, %c0_i32 : i32
    %1 = arith.extui %0 : i1 to i32
    %c0_i32_0 = arith.constant 0 : i32
    %2 = arith.cmpi ne, %1, %c0_i32_0 : i32
    scf.if %2 {
      %cst_9 = arith.constant 0.000000e+00 : f32
      %12 = vector.broadcast %cst_9 : f32 to vector<8x128xf32>
      %c0_10 = arith.constant 0 : index
      %c0_11 = arith.constant 0 : index
      %13 = vector.load %arg8[%c0_10, %c0_11] : memref<8x128xf32, #tpu.memory_space<vmem>>, vector<8x128xf32>
      tpu.vector_store %arg8[%c0_10, %c0_11], %12 {strides = array<i32>} : memref<8x128xf32, #tpu.memory_space<vmem>>, vector<8x128xf32>,
    } else {
    }
    %c0 = arith.constant 0 : index
    %c0_1 = arith.constant 0 : index
    %3 = vector.load %arg8[%c0, %c0_1] : memref<8x128xf32, #tpu.memory_space<vmem>>, vector<8x128xf32>
    %c0_2 = arith.constant 0 : index
    %c0_3 = arith.constant 0 : index
    %4 = vector.load %arg2[%c0_2, %c0_3] : memref<8x512xbf16, #tpu.memory_space<vmem>>, vector<8x512xbf16>
    %c0_4 = arith.constant 0 : index
    %c0_5 = arith.constant 0 : index
    %5 = vector.load %arg3[%c0_4, %c0_5] : memref<512x128xbf16, #tpu.memory_space<vmem>>, vector<512x128xbf16>
    %cst = arith.constant dense<0.000000e+00> : vector<8x128xf32>
    %6 = tpu.matmul %4, %5, %cst {dimension_numbers = #tpu.dot_dimension_numbers<[1], [0], [0], [1], [0, 0, 1, 1], [], []>} : vector<8x512xbf16>, vector<512x128xbf16>, vector<8x128xf32> -> vector<8x128xf32>
    %7 = arith.addf %3, %6 : vector<8x128xf32>
    %c0_6 = arith.constant 0 : index
    %c0_7 = arith.constant 0 : index
    %8 = vector.load %arg8[%c0_6, %c0_7] : memref<8x128xf32, #tpu.memory_space<vmem>>, vector<8x128xf32>
    tpu.vector_store %arg8[%c0_6, %c0_7], %7 {strides = array<i32>} : memref<8x128xf32, #tpu.memory_space<vmem>>, vector<8x128xf32>,
    %c1_i32 = arith.constant 1 : i32
    %9 = arith.cmpi eq, %arg1, %c1_i32 : i32
    %10 = arith.extui %9 : i1 to i32
    %c0_i32_8 = arith.constant 0 : i32
    %11 = arith.cmpi ne, %10, %c0_i32_8 : i32
    scf.if %11 {
      %c0_9 = arith.constant 0 : index
      %c0_10 = arith.constant 0 : index
      %12 = vector.load %arg8[%c0_9, %c0_10] : memref<8x128xf32, #tpu.memory_space<vmem>>, vector<8x128xf32>
      %c0_11 = arith.constant 0 : index
      %c0_12 = arith.constant 0 : index
      %13 = vector.load %arg4[%c0_11, %c0_12] : memref<1x128xf32, #tpu.memory_space<vmem>>, vector<1x128xf32>
      %14 = vector.broadcast %13 : vector<1x128xf32> to vector<8x128xf32>
      %15 = arith.addf %12, %14 : vector<8x128xf32>
      %cst_13 = arith.constant 0.000000e+00 : f32
      %16 = vector.broadcast %cst_13 : f32 to vector<8x128xf32>
      %17 = arith.maximumf %15, %16 : vector<8x128xf32>
      %18 = arith.truncf %17 : vector<8x128xf32> to vector<8x128xbf16>
      %c0_14 = arith.constant 0 : index
      %c0_15 = arith.constant 0 : index
      %19 = vector.load %arg5[%c0_14, %c0_15] : memref<128x128xbf16, #tpu.memory_space<vmem>>, vector<128x128xbf16>
      %cst_16 = arith.constant dense<0.000000e+00> : vector<8x128xf32>
      %20 = tpu.matmul %18, %19, %cst_16 {dimension_numbers = #tpu.dot_dimension_numbers<[1], [0], [0], [1], [0, 0, 1, 1], [], []>} : vector<8x128xbf16>, vector<128x128xbf16>, vector<8x128xf32> -> vector<8x128xf32>
      %c0_17 = arith.constant 0 : index
      %c0_18 = arith.constant 0 : index
      %21 = vector.load %arg6[%c0_17, %c0_18] : memref<1x128xf32, #tpu.memory_space<vmem>>, vector<1x128xf32>
      %22 = vector.broadcast %21 : vector<1x128xf32> to vector<8x128xf32>
      %23 = arith.addf %20, %22 : vector<8x128xf32>
      %c0_19 = arith.constant 0 : index
      %c0_20 = arith.constant 0 : index
      %24 = vector.load %arg7[%c0_19, %c0_20] : memref<8x128xf32, #tpu.memory_space<vmem>>, vector<8x128xf32>
      tpu.vector_store %arg7[%c0_19, %c0_20], %23 {strides = array<i32>} : memref<8x128xf32, #tpu.memory_space<vmem>>, vector<8x128xf32>,
    } else {
    }
    return
  }
  func.func @transform_0(%arg0: i32, %arg1: i32) -> (i32, i32) {
    %c0_i32 = arith.constant 0 : i32
    return %arg0, %arg1 : i32, i32
  }
  func.func @transform_1(%arg0: i32, %arg1: i32) -> (i32, i32) {
    %c0_i32 = arith.constant 0 : i32
    %c0_i32_0 = arith.constant 0 : i32
    return %arg1, %c0_i32 : i32, i32
  }
  func.func @transform_2(%arg0: i32, %arg1: i32) -> (i32, i32) {
    %c0_i32 = arith.constant 0 : i32
    %c0_i32_0 = arith.constant 0 : i32
    %c0_i32_1 = arith.constant 0 : i32
    return %c0_i32, %c0_i32_0 : i32, i32
  }
  func.func @transform_3(%arg0: i32, %arg1: i32) -> (i32, i32) {
    %c0_i32 = arith.constant 0 : i32
    %c0_i32_0 = arith.constant 0 : i32
    %c0_i32_1 = arith.constant 0 : i32
    return %c0_i32, %c0_i32_0 : i32, i32
  }
  func.func @transform_4(%arg0: i32, %arg1: i32) -> (i32, i32) {
    %c0_i32 = arith.constant 0 : i32
    %c0_i32_0 = arith.constant 0 : i32
    %c0_i32_1 = arith.constant 0 : i32
    return %c0_i32, %c0_i32_0 : i32, i32
  }
  func.func @transform_5(%arg0: i32, %arg1: i32) -> (i32, i32) {
    %c0_i32 = arith.constant 0 : i32
    %c0_i32_0 = arith.constant 0 : i32
    return %arg0, %c0_i32 : i32, i32
  }
}

</mosaic_0001>

<bundles_post_ra>
// kernel: tpu_custom_call.1
= control target key start
LH: loop header
LB: loop body
LE: loop exit
PB: predicated region body
PF: predicated region fallthrough
CT: control target
= control target key end

     0   :  { %10 = vsyncpa [#allocation4], 0  ;;  %s1655_s0 = inlined_call_operand.hbm [shape: bf16[8,1024], index: 0, kind: input, shape index: {}]   ;;  %s1656_s1 = inlined_call_operand.hbm [shape: bf16[1024,128], index: 1, kind: input, shape index: {}]   ;;  %s1657_s2 = inlined_call_operand.vmem [shape: f32[1,128], index: 2, kind: input, shape index: {}]   ;;  %s1658_s3 = inlined_call_operand.hbm [shape: bf16[128,128], index: 3, kind: input, shape index: {}]   ;;  %s1659_s4 = inlined_call_operand.vmem [shape: f32[1,128], index: 4, kind: input, shape index: {}]   ;;  %s1660_s5 = inlined_call_operand.hbm [shape: f32[8,128], index: 5, kind: output, shape index: {}]  }
   0x1   :  { %12 = vsyncpa [#allocation4 + $0x1], 0 }
   0x2   :  { %13 = vsyncpa [#allocation7], 0 }
   0x3   :  { %15 = vsyncpa [#allocation7 + $0x1], 0 }
   0x4   :  { %16 = vsyncpa [#allocation5], 0  ;;  %s1384_s18 = smov 0   ;;  %s1386_s19 = smov 0  }
   0x5   :  { %s1388_s20 = smov 0   ;;  %s1390_s21 = smov 0  }
   0x6   :  { %s1392_s22 = smov 0   ;;  %s1394_s23 = smov 0  }
   0x7 LB: > { %s1413_s24 = sadd.s32 4294967295, %s1343_s23   ;;  %p56_p0 = scmp.ne.s32.totalorder %s1327_s19, %s1323_s18  ;;  %s1343_s23 = sphi %s1394_s23, %s22_s23   ;;  %s1339_s22 = sphi %s1392_s22, %s1680_s22   ;;  %s1335_s21 = sphi %s1390_s21, %s1679_s21   ;;  %s1331_s20 = sphi %s1388_s20, %s1678_s20   ;;  %s1327_s19 = sphi %s1386_s19, %s1677_s19   ;;  %s1323_s18 = sphi %s1384_s18, %s1676_s18  }
   0x8   : > { %p1661_p1 = scmp.eq.s32.totalorder %s1413_s24, 0  ;;  %p900_p2 = scmp.ge.s32.totalorder %s1343_s23, 1 }
   0x9   : > { %p182_p3 = scmp.lt.s32.totalorder %s1343_s23, 3  ;;  %s1345_s27 = smov [#allocation8]  }
   0xa   : > { %p1421_p4 = por %p1661_p1, %p56_p0  ;;  %s197_s28 = sshll.u32 %s1345_s27, 4  ;;  %s198_s28 = int_to_ptr.vmem [resolvable:$true] %s197_s28 }
   0xb   : > { %p1425_p5 = pnand %p900_p2, %p182_p3  ;;  %s31_s30 = sadd.s32 1, %s1339_s22 }
   0xc   : > { %s1666_s25 = scalar_select %p1421_p4, 1, 0 }
   0xd   : > { %s1667_s26 = scalar_select %p1425_p5, 1, 0 }
   0xe   : > { %p1052_p6 = pneg %p1425_p5  ;;  %s1167_s8 = scalar_lea.hbm %s1658_s3, 1024 }
   0xf   : > { %p1168_p8 = scmp.ne.s32.totalorder %s1658_s3, %s1167_s8  ;;  %p1174_p12 = scmp.lt.u32.totalorder %s1167_s8, %s1658_s3 }
  0x10   : > { %p1433_p7 = pnand %p1052_p6, %p1661_p1 }
  0x12   : > { %p1169_p9 = pneg %p1433_p7 }
  0x14   : > { %p1170_p10 = pnand %p1169_p9, %p1168_p8 }
  0x16   : > { %p1171_p11 = pneg %p1170_p10 }
  0x18   : > { %p1176_p13 = pnand %p1174_p12, %p1171_p11 }
  0x1a   : > { %1179 = shalt.err (!%p1176_p13)
}
  0x1b   : > { %s1180_s13 = scalar_lea.vmem %s198_s28, 1024  ;;  %p1188_p6 = scmp.lt.s32.totalorder %s198_s28, %s198_s28 }
  0x1c   : > { %p1181_p0 = scmp.ne.s32.totalorder %s198_s28, %s1180_s13  ;;  %p1189_p1 = scmp.lt.s32.totalorder %s1180_s13, %s1180_s13 }
  0x1e   : > { %p1183_p2 = pnand %p1181_p0, %p1169_p9  ;;  %p1190_p4 = por %p1189_p1, %p1188_p6 }
  0x20   : > { %p1184_p3 = pneg %p1183_p2 }
  0x22   : > { %p1191_p5 = pnand %p1190_p4, %p1184_p3 }
  0x24   : > { %1194 = shalt.err (!%p1191_p5)
}
  0x25   : > { %s1664_s14 = smov 64   ;;  %s1665_s15 = smov 4  }
  0x26   : > { %1055 = dma.hbm_to_vmem [thread:$0]  (!%p1433_p7), %s1658_s3, 1024, %s198_s28, [#allocation7], %s1664_s14, %s1664_s14, %s1665_s15  }
  0x27   : > { %p32_p1 = scmp.ge.s32.totalorder %s31_s30, 2  ;;  %s43_s18 = sadd.s32 1, %s1331_s20 }
  0x28   : > { %p50_p4 = scmp.ne.s32.totalorder %s1331_s20, %s1327_s19  ;;  %p51_p5 = scmp.eq.s32.totalorder %s1343_s23, 0 }
  0x29   : > { %s1682_s30 = smov (%p32_p1, %s31_s30), 0  ;;  %p1064_p9 = scmp.lt.s32.totalorder %s1343_s23, 2 }
  0x2a   : > { %p52_p8 = por %p51_p5, %p50_p4  ;;  %s39_s27 = ssub.s32 %s1339_s22, %s1682_s30 }
  0x2b   : > { %s1467_s6 = sand.u32 1, %s1331_s20   ;;  %p41_p10 = scmp.eq.s32.totalorder %s39_s27, 0 }
  0x2c   : > { %s903_s29 = sshll.u32 %s1467_s6, 4  ;;  %s965_s7 = sshll.u32 %s1339_s22, 8 }
  0x2d   : > { %s1472_s8 = scalar_select %p41_p10, %s1331_s20, %s43_s18  }
  0x2e   : > { %s1477_s10 = scalar_lea.hbm %s1655_s0, %s965_s7  ;;  %s218_s11 = scalar_lea.vmem [#allocation3], %s903_s29 }
  0x2f   : > { %s228_s12 = sshll.u32 %s218_s11, 4  ;;  %p1479_p7 = pnand %p1064_p9, %p52_p8  ;;  %s1483_s12 = int_to_ptr.vmem [resolvable:$true] %s228_s12 }
  0x30   : > { %s906_s16 = sshll.u32 %s1467_s6, 8  ;;  %s215_s17 = scalar_lea.sflag [#allocation4], %s1467_s6 }
  0x31   : > { %s1195_s18 = scalar_lea.hbm %s1477_s10, 256  ;;  %p1197_p12 = pneg %p1479_p7 }
  0x32   : > { %p1196_p11 = scmp.ne.s32.totalorder %s1477_s10, %s1195_s18  ;;  %s1200_s7 = scalar_lea.hbm %s1655_s0, 512 }
  0x33   : > { %p1201_p2 = scmp.lt.u32.totalorder %s1477_s10, %s1655_s0  ;;  %p1202_p3 = scmp.lt.u32.totalorder %s1200_s7, %s1195_s18 }
  0x34   : > { %p1198_p13 = pnand %p1197_p12, %p1196_p11  ;;  %p1204_p1 = scmp.lt.u32.totalorder %s1195_s18, %s1477_s10 }
  0x35   : > { %p1203_p6 = por %p1202_p3, %p1201_p2 }
  0x36   : > { %p1199_p0 = pneg %p1198_p13 }
  0x37   : > { %p1205_p4 = por %p1204_p1, %p1203_p6 }
  0x39   : > { %p1206_p5 = pnand %p1205_p4, %p1199_p0 }
  0x3b   : > { %1209 = shalt.err (!%p1206_p5)
}
  0x3c   : > { %s1210_s11 = scalar_lea.vmem %s1483_s12, 256  ;;  %s1348_s27 = smov [#allocation3]  }
  0x3d   : > { %p1211_p8 = scmp.ne.s32.totalorder %s1483_s12, %s1210_s11  ;;  %s1215_s29 = sshll.u32 %s1348_s27, 4  ;;  %s1216_s29 = int_to_ptr.vmem [resolvable:$false] %s1215_s29 }
  0x3e   : > { %s1217_s28 = scalar_lea.vmem %s1216_s29, 512  ;;  %p1218_p11 = scmp.lt.s32.totalorder %s1483_s12, %s1216_s29 }
  0x3f   : > { %p1213_p9 = pnand %p1211_p8, %p1197_p12  ;;  %p1219_p13 = scmp.lt.s32.totalorder %s1217_s28, %s1210_s11 }
  0x41   : > { %p1214_p10 = pneg %p1213_p9  ;;  %p1220_p2 = por %p1219_p13, %p1218_p11 }
  0x43   : > { %p1221_p3 = pnand %p1220_p2, %p1214_p10 }
  0x45   : > { %1224 = shalt.err (!%p1221_p3)
}
  0x46   : > { %1059 = dma.hbm_to_vmem [thread:$0]  (!%p1479_p7), %s1477_s10, 256, %s1483_s12, %s215_s17  }
  0x47   : > { %s966_s18 = sshll.u32 %s1339_s22, 12  ;;  %s239_s7 = scalar_lea.vmem [#allocation6], %s906_s16 }
  0x48   : > { %s246_s9 = sshll.u32 %s239_s7, 4  ;;  %s235_s27 = sand.u32 1, %s1343_s23   ;;  %s1515_s9 = int_to_ptr.vmem [resolvable:$true] %s246_s9 }
  0x49   : > { %s1521_s28 = scalar_lea.hbm %s1656_s1, %s966_s18  ;;  %s1523_s14 = scalar_lea.sflag [#allocation7], %s235_s27 }
  0x4a   : > { %s1225_s15 = scalar_lea.hbm %s1521_s28, 4096  ;;  %s1230_s12 = scalar_lea.hbm %s1656_s1, 8192 }
  0x4b   : > { %p1226_p0 = scmp.ne.s32.totalorder %s1521_s28, %s1225_s15  ;;  %p1231_p4 = scmp.lt.u32.totalorder %s1521_s28, %s1656_s1 }
  0x4c   : > { %p1232_p5 = scmp.lt.u32.totalorder %s1230_s12, %s1225_s15  ;;  %p1234_p9 = scmp.lt.u32.totalorder %s1225_s15, %s1521_s28 }
  0x4d   : > { %p1228_p6 = pnand %p1226_p0, %p1197_p12 }
  0x4e   : > { %p1233_p8 = por %p1232_p5, %p1231_p4 }
  0x4f   : > { %p1229_p1 = pneg %p1228_p6 }
  0x50   : > { %p1235_p10 = por %p1234_p9, %p1233_p8 }
  0x52   : > { %p1236_p11 = pnand %p1235_p10, %p1229_p1 }
  0x54   : > { %1239 = shalt.err (!%p1236_p11)
}
  0x55   : > { %s1240_s18 = scalar_lea.vmem %s1515_s9, 4096  ;;  %s1349_s7 = smov [#allocation6]  }
  0x56   : > { %p1241_p13 = scmp.ne.s32.totalorder %s1515_s9, %s1240_s18  ;;  %s1245_s27 = sshll.u32 %s1349_s7, 4  ;;  %s1246_s27 = int_to_ptr.vmem [resolvable:$false] %s1245_s27 }
  0x57   : > { %s1247_s11 = scalar_lea.vmem %s1246_s27, 8192  ;;  %p1248_p0 = scmp.lt.s32.totalorder %s1515_s9, %s1246_s27 }
  0x58   : > { %p1243_p2 = pnand %p1241_p13, %p1197_p12  ;;  %p1249_p6 = scmp.lt.s32.totalorder %s1247_s11, %s1240_s18 }
  0x5a   : > { %p1244_p3 = pneg %p1243_p2  ;;  %p1250_p4 = por %p1249_p6, %p1248_p0 }
  0x5c   : > { %p1251_p5 = pnand %p1250_p4, %p1244_p3 }
  0x5e   : > { %1254 = shalt.err (!%p1251_p5)
}
  0x5f   : > { %s1670_s15 = smov 4   ;;  %s1671_s29 = smov 64  }
  0x60   : > { %1062 = dma.hbm_to_vmem [thread:$0]  (!%p1479_p7), %s1521_s28, 4096, %s1515_s9, %s1523_s14, %s1671_s29, %s1671_s29, %s1670_s15  }
  0x61   : > { %p1672_p12 = scmp.ne.s32.totalorder %s1667_s26, 0 }
  0x62   : > { %s260_s6 = sand.u32 (!%p1672_p12), 1, %s1327_s19   ;;  %p1673_p1 = scmp.ne.s32.totalorder (!%p1672_p12), %s1666_s25, 0 }
  0x63   : > { %258 = sbr.rel (%p1672_p12) target bundleno = 630 (0x276), region = 40  ;;  %s910_s10 = sshll.u32 (!%p1672_p12), %s260_s6, 4 }
  0x64   : > { %s261_s12 = scalar_lea.sflag (!%p1672_p12), [#allocation4], %s260_s6  ;;  %s1555_s16 = scalar_lea.vmem (!%p1672_p12), [#allocation3], %s910_s10 }
  0x6a   : > { %1306 = dma.done.wait (%p1673_p1), %s261_s12, 256  }
  0x6b   : > { %1308 = vsyncadd (%p1673_p1), %s261_s12, 4294967040  ;;  %s269_s13 = sand.u32 1, %s1413_s24   ;;  %s911_s17 = sshll.u32 %s260_s6, 8 }
  0x6c   : > { %s270_s14 = scalar_lea.sflag [#allocation7], %s269_s13  ;;  %s1562_s9 = scalar_lea.vmem [#allocation6], %s911_s17 }
  0x6d   : > { %1310 = dma.done.wait (%p1673_p1), %s270_s14, 4096  }
  0x6e   : > { %1312 = vsyncadd (%p1673_p1), %s270_s14, 4294963200  ;;  %p1674_p7 = scmp.eq.s32.totalorder %s1413_s24, 0 }
  0x70   : > { %1314 = dma.done.wait (%p1674_p7), [#allocation7], 1024   ;;  %p1675_p8 = pmov %p1674_p7 }
  0x71   : > { %p913_p9 = scmp.ne.s32.totalorder %s1335_s21, 0 }
  0x72   : > { %1316 = vsyncadd (%p1675_p8), [#allocation7], 4294966272  ;;  %v1350_v0 = vmov (!%p913_p9), 0.0  }
  0x73   : > { %310 = sbr.rel (%p913_p9) target bundleno = 122 (0x7a), region = 56  ;;  %311 = vst [vmem:[#allocation2] sm:$0xff] (!%p913_p9), %v1350_v0 }
  0x7a PF: > { %v1123_v1 = vld [vmem:[%s1562_s9 + $0x40] sm:$0xff]   ;;  %v1127_v5 = vld [vmem:[%s1562_s9 + $0x48] sm:$0xff]   ;;  %v1131_v9 = vld [vmem:[%s1562_s9 + $0x50] sm:$0xff]   ;;  %p950_p10 = scmp.ne.s32.totalorder %s1335_s21, 1 }
  0x7b   : > { %v1124_v2 = vld [vmem:[%s1562_s9 + $0xc0] sm:$0xff]   ;;  %967 = vmatprep.subr.bf16.mxu0 %v1123_v1  ;;  %v1128_v6 = vld [vmem:[%s1562_s9 + $0xc8] sm:$0xff]   ;;  %v1132_v10 = vld [vmem:[%s1562_s9 + $0xd0] sm:$0xff]   ;;  %v1351_v53 = vmov (!%p950_p10), 0.0   ;;  %vm1352_vm0 = vmmov (!%p950_p10), 0  }
  0x7c   : > { %v1125_v3 = vld [vmem:[%s1562_s9] sm:$0xff]   ;;  %989 = vmatprep.subr.bf16.mxu1 %v1124_v2  ;;  %v1129_v7 = vld [vmem:[%s1562_s9 + $0x8] sm:$0xff]   ;;  %v1133_v11 = vld [vmem:[%s1562_s9 + $0x10] sm:$0xff]  }
  0x7d   : > { %v1126_v4 = vld [vmem:[%s1562_s9 + $0x80] sm:$0xff]   ;;  %968 = vmatpush3.bf16.msra.mxu0 %v1125_v3  ;;  %v1130_v8 = vld [vmem:[%s1562_s9 + $0x88] sm:$0xff]   ;;  %v1134_v12 = vld [vmem:[%s1562_s9 + $0x90] sm:$0xff]  }
  0x7e   : > { %990 = vmatpush3.bf16.msra.mxu1 %v1126_v4  ;;  %969 = vmatprep.subr.bf16.mxu0 %v1127_v5  ;;  %v1135_v13 = vld [vmem:[%s1562_s9 + $0x58] sm:$0xff]   ;;  %v1139_v17 = vld [vmem:[%s1562_s9 + $0x60] sm:$0xff]   ;;  %v1143_v21 = vld [vmem:[%s1562_s9 + $0x68] sm:$0xff]  }
  0x7f   : > { %991 = vmatprep.subr.bf16.mxu1 %v1128_v6  ;;  %v1136_v14 = vld [vmem:[%s1562_s9 + $0xd8] sm:$0xff]   ;;  %v1140_v18 = vld [vmem:[%s1562_s9 + $0xe0] sm:$0xff]   ;;  %v1144_v22 = vld [vmem:[%s1562_s9 + $0xe8] sm:$0xff]  }
  0x80   : > { %v1137_v15 = vld [vmem:[%s1562_s9 + $0x18] sm:$0xff]   ;;  %v1141_v19 = vld [vmem:[%s1562_s9 + $0x20] sm:$0xff]   ;;  %v1145_v23 = vld [vmem:[%s1562_s9 + $0x28] sm:$0xff]  }
  0x81   : > { %970 = vmatpush3.bf16.msra.mxu0 %v1129_v7  ;;  %v1138_v16 = vld [vmem:[%s1562_s9 + $0x98] sm:$0xff]   ;;  %v1142_v20 = vld [vmem:[%s1562_s9 + $0xa0] sm:$0xff]   ;;  %v1146_v24 = vld [vmem:[%s1562_s9 + $0xa8] sm:$0xff]  }
  0x82   : > { %992 = vmatpush3.bf16.msra.mxu1 %v1130_v8  ;;  %971 = vmatprep.subr.bf16.mxu0 %v1131_v9  ;;  %v1147_v25 = vld [vmem:[%s1562_s9 + $0x70] sm:$0xff]   ;;  %v1151_v29 = vld [vmem:[%s1562_s9 + $0x78] sm:$0xff]   ;;  %v1159_v52 = vld [vmem:[#allocation8] sm:$0xff] (!%p950_p10)  }
  0x83   : > { %993 = vmatprep.subr.bf16.mxu1 %v1132_v10  ;;  %v1148_v26 = vld [vmem:[%s1562_s9 + $0xf0] sm:$0xff]   ;;  %v1152_v30 = vld [vmem:[%s1562_s9 + $0xf8] sm:$0xff]   ;;  %v1160_v54 = vld [vmem:[#allocation8 + $0x8] sm:$0xff] (!%p950_p10)  }
  0x84   : > { %v1149_v27 = vld [vmem:[%s1562_s9 + $0x30] sm:$0xff]   ;;  %v1153_v31 = vld [vmem:[%s1562_s9 + $0x38] sm:$0xff]   ;;  %v1163_v57 = vld [vmem:[#allocation8 + $0x20] sm:$0xff] (!%p950_p10)  }
  0x85   : > { %972 = vmatpush3.bf16.msra.mxu0 %v1133_v11  ;;  %v1150_v28 = vld [vmem:[%s1562_s9 + $0xb0] sm:$0xff]   ;;  %v1154_v32 = vld [vmem:[%s1562_s9 + $0xb8] sm:$0xff]   ;;  %v1164_v58 = vld [vmem:[#allocation8 + $0x28] sm:$0xff] (!%p950_p10)  }
  0x86   : > { %994 = vmatpush3.bf16.msra.mxu1 %v1134_v12  ;;  %973 = vmatprep.subr.bf16.mxu0 %v1135_v13  ;;  %v313_v33 = vld [vmem:[%s1555_s16] sm:$0xff]  ;;  %v314_v34 = vld [vmem:[%s1555_s16 + $0x8] sm:$0xff] }
  0x87   : > { %995 = vmatprep.subr.bf16.mxu1 %v1136_v14  ;;  %v914_v35 = vcombine.low %v313_v33, %v313_v33  ;;  %v915_v36 = vcombine.high %v313_v33, %v313_v33  ;;  %v916_v37 = vcombine.low %v314_v34, %v314_v34  ;;  %v917_v38 = vcombine.high %v314_v34, %v314_v34  ;;  %v312_v47 = vld [vmem:[#allocation2] sm:$0xff]  ;;  %v1161_v55 = vld [vmem:[#allocation8 + $0x10] sm:$0xff] (!%p950_p10)  }
  0x88   : > { %v1162_v56 = vld [vmem:[#allocation8 + $0x18] sm:$0xff] (!%p950_p10)   ;;  %v1165_v62 = vld [vmem:[#allocation8 + $0x30] sm:$0xff] (!%p950_p10)  }
  0x89   : > { %974 = vmatpush3.bf16.msra.mxu0 %v1137_v15  ;;  %617 = vmatprep.mubr.bf16.mxu0 %v915_v36  ;;  %v951_v60 = vld [vmem:[%s1657_s2] ss:$0 sm:$0xff] (!%p950_p10) }
  0x8a   : > { %996 = vmatpush3.bf16.msra.mxu1 %v1138_v16  ;;  %975 = vmatprep.subr.bf16.mxu0 %v1139_v17  ;;  %v1166_v0 = vld [vmem:[#allocation8 + $0x38] sm:$0xff] (!%p950_p10)  }
  0x8b   : > { %997 = vmatprep.subr.bf16.mxu1 %v1140_v18  ;;  %657 = vmatprep.mubr.bf16.mxu1 %v917_v38  ;;  %v952_v2 = vld [vmem:[%s1659_s4] ss:$0 sm:$0xff] (!%p950_p10) }
  0x8d   : > { %976 = vmatpush3.bf16.msra.mxu0 %v1141_v19 }
  0x8e   : > { %998 = vmatpush3.bf16.msra.mxu1 %v1142_v20  ;;  %977 = vmatprep.subr.bf16.mxu0 %v1143_v21 }
  0x8f   : > { %999 = vmatprep.subr.bf16.mxu1 %v1144_v22 }
  0x91   : > { %978 = vmatpush3.bf16.msra.mxu0 %v1145_v23 }
  0x92   : > { %1000 = vmatpush3.bf16.msra.mxu1 %v1146_v24  ;;  %979 = vmatprep.subr.bf16.mxu0 %v1147_v25 }
  0x93   : > { %1001 = vmatprep.subr.bf16.mxu1 %v1148_v26 }
  0x95   : > { %980 = vmatpush3.bf16.msra.mxu0 %v1149_v27 }
  0x96   : > { %1002 = vmatpush3.bf16.msra.mxu1 %v1150_v28  ;;  %981 = vmatprep.subr.bf16.mxu0 %v1151_v29 }
  0x97   : > { %1003 = vmatprep.subr.bf16.mxu1 %v1152_v30 }
  0x99   : > { %982 = vmatpush3.bf16.msra.mxu0 %v1153_v31 }
  0x9a   : > { %1004 = vmatpush3.bf16.msra.mxu1 %v1154_v32  ;;  %1020 = vmatprep.subr.bf16.mxu0 (!%p950_p10), %v1351_v53 }
  0x9c   : > { %618 = vmatmul.mubr.bf16.vlgmr.msra.gmra.mrb[0].mxu0 %v914_v35 }
  0x9d   : > { %658 = vmatmul.mubr.bf16.vlgmr.msra.gmra.mrb[0].mxu1 %v916_v37  ;;  %1021 = vmatpush3.bf16.msra.mxu0 (!%p950_p10), %v1159_v52 }
  0x9e   : > { %1036 = vmatprep.mubr.msk.bf16.mxu0 (!%p950_p10), %vm1352_vm0, %v1351_v53  ;;  %1022 = vmatprep.subr.bf16.mxu0 (!%p950_p10), %v1351_v53 }
  0xa1   : > { %1023 = vmatpush3.bf16.msra.mxu0 (!%p950_p10), %v1160_v54 }
  0xa2   : > { %1024 = vmatprep.subr.bf16.mxu0 (!%p950_p10), %v1351_v53 }
  0xa5   : > { %1025 = vmatpush3.bf16.msra.mxu0 (!%p950_p10), %v1161_v55 }
  0xa6   : > { %1026 = vmatprep.subr.bf16.mxu0 (!%p950_p10), %v1351_v53 }
  0xa9   : > { %1027 = vmatpush3.bf16.msra.mxu0 (!%p950_p10), %v1162_v56 }
  0xaa   : > { %1028 = vmatprep.subr.bf16.mxu0 (!%p950_p10), %v1351_v53 }
  0xad   : > { %1029 = vmatpush3.bf16.msra.mxu0 (!%p950_p10), %v1163_v57 }
  0xae   : > { %1030 = vmatprep.subr.bf16.mxu0 (!%p950_p10), %v1351_v53 }
  0xb1   : > { %1031 = vmatpush3.bf16.msra.mxu0 (!%p950_p10), %v1164_v58 }
  0xb2   : > { %1032 = vmatprep.subr.bf16.mxu0 (!%p950_p10), %v1351_v53 }
  0xb5   : > { %1033 = vmatpush3.bf16.msra.mxu0 (!%p950_p10), %v1165_v62 }
  0xb6   : > { %1034 = vmatprep.subr.bf16.mxu0 (!%p950_p10), %v1351_v53 }
  0xb9   : > { %1035 = vmatpush3.bf16.msra.mxu0 (!%p950_p10), %v1166_v0 }
 0x16f   : > { %v983_v39 = vpop.f32.mrb[0].mxu0 }
 0x170   : > { %v1005_v40 = vpop.f32.mrb[0].mxu1  ;;  %v984_v41 = vpop.f32.mrb[1].mxu0 }
 0x171   : > { %v1006_v42 = vpop.f32.mrb[1].mxu1  ;;  %v985_v43 = vadd.f32 %v984_v41, %v983_v39  ;;  %v986_v45 = vpop.f32.mrb[2].mxu0 }
 0x172   : > { %v1007_v44 = vadd.f32 %v1006_v42, %v1005_v40  ;;  %v1008_v46 = vpop.f32.mrb[2].mxu1  ;;  %v987_v48 = vpop.f32.mrb[3].mxu0  ;;  %670 = sbr.rel (%p950_p10) target bundleno = 605 (0x25d), region = 60 }
 0x173   : > { %v1009_v49 = vpop.f32.mrb[3].mxu1 }
 0x174   : > { %v660_v50 = vadd.f32 %v1007_v44, %v985_v43 }
 0x176   : > { %v665_v51 = vadd.f32 %v660_v50, %v312_v47 }
 0x178   : > { %666 = vst [vmem:[#allocation2] sm:$0xff] %v665_v51 }
 0x17f   : > { %v671_v59 = vld [vmem:[#allocation2] sm:$0xff] }
 0x180   : > { %v679_v61 = vadd.f32 %v951_v60, %v671_v59 }
 0x182   : > { %v680_v63 = vmax.f32 %v679_v61, 0.0 }
 0x184   : > { %v681_v1 = vpack.c.bf16 %v680_v63, %v680_v63 }
 0x186   : > { %1037 = vmatmul.mubr.bf16.vlgmr.msra.gmra.mrb[0].mxu0 %v681_v1 }
 0x259   : > { %v787_v3 = vpop.f32.mrb[0].mxu0 }
 0x25a   : > { %v788_v4 = vadd.f32 %v952_v2, %v787_v3  ;;  %v1038_v5 = vpop.f32.mrb[1].mxu0 }
 0x25b   : > { %v790_v6 = vpop.f32.mrb[2].mxu0 }
 0x25c   : > { %793 = vst [vmem:[#allocation9] sm:$0xff] %v788_v4  ;;  %v1039_v7 = vpop.f32.mrb[3].mxu0 }
 0x25d PF: > { %p1066_p11 = scmp.eq.s32.totalorder %s1413_s24, 1  ;;  %s1353_s18 = smov [#allocation9]  }
 0x25e   : > { %s803_s7 = sshll.u32 %s1353_s18, 4  ;;  %s804_s7 = int_to_ptr.vmem [resolvable:$true] %s803_s7 }
 0x25f   : > { %s1255_s27 = scalar_lea.vmem %s804_s7, 128  ;;  %p1262_p0 = scmp.lt.s32.totalorder %s804_s7, %s804_s7 }
 0x260   : > { %p1256_p13 = scmp.ne.s32.totalorder %s804_s7, %s1255_s27  ;;  %p1263_p6 = scmp.lt.s32.totalorder %s1255_s27, %s1255_s27 }
 0x262   : > { %p1257_p2 = pnand %p1256_p13, %p1066_p11  ;;  %p1264_p4 = por %p1263_p6, %p1262_p0 }
 0x264   : > { %p1258_p3 = pneg %p1257_p2 }
 0x266   : > { %p1265_p5 = pnand %p1264_p4, %p1258_p3 }
 0x268   : > { %1268 = shalt.err (!%p1265_p5)
}
 0x269   : > { %s1269_s29 = scalar_lea.hbm %s1660_s5, 128 }
 0x26a   : > { %p1270_p12 = scmp.ne.s32.totalorder %s1660_s5, %s1269_s29  ;;  %p1275_p8 = scmp.lt.u32.totalorder %s1269_s29, %s1660_s5 }
 0x26c   : > { %p1271_p1 = pnand %p1270_p12, %p1066_p11 }
 0x26e   : > { %p1272_p7 = pneg %p1271_p1 }
 0x270   : > { %p1277_p9 = pnand %p1275_p8, %p1272_p7 }
 0x272   : > { %1280 = shalt.err (!%p1277_p9)
}
 0x273   : > { %1049 = dma.vmem_to_hbm [thread:$0]  (%p1066_p11), %s804_s7, 128, %s1660_s5, [#allocation5]  }
 0x274   : > { %1318 = dma.done.wait (%p1066_p11), [#allocation5], 128  }
 0x275   : > { %1320 = vsyncadd (%p1066_p11), [#allocation5], 4294967168 }
 0x276 PF: > { %s22_s23 = sadd.s32 1, %s1343_s23   ;;  %s1676_s18 = smov %s1327_s19 }
 0x277   : > { %p19_p10 = scmp.ge.s32.totalorder %s22_s23, 4   ;;  %s1677_s19 = smov %s1331_s20 }
 0x278   : > { %s1678_s20 = smov %s1472_s8  ;;  %s1679_s21 = smov %s1339_s22 }
 0x279   : > { %s1680_s22 = smov %s1682_s30  ;;  %21 = sbr.rel (!%p19_p10) target bundleno = 7 (0x7), region = 103 }
 0x280   :  { %816 = vsyncpa [#allocation4], 1 }
 0x281   :  { %818 = vsyncpa [#allocation4 + $0x1], 1 }
 0x282   :  { %819 = vsyncpa [#allocation7], 1 }
 0x283   :  { %821 = vsyncpa [#allocation7 + $0x1], 1 }
 0x284   :  { %822 = vsyncpa [#allocation5], 1 }
 0x285   :  { %824 = vsyncpa [#allocation5 + $0x1], 1 }

</bundles_post_ra>
